<compile_context>
chip_gen: v7x
topology: tpu7x:2x2x1
jax: 0.10.0
libtpu: 0.0.40
codegen_flags: <defaults>
</compile_context>

<pallas_src>
import functools

import jax
import jax.numpy as jnp
from jax.experimental import pallas as pl
from jax.experimental.pallas import tpu as pltpu


def _round_up(x, m):
    return (x + m - 1) // m * m


def _leaky_relu(x, slope=0.2):
    return jnp.where(x > 0, x, slope * x)


def _resident_spec(a):
    """Full-block, constant-index BlockSpec -> weight stays resident in VMEM.

    Constant index_map means the block never changes across grid steps, so a
    single pipeline buffer suffices (halves resident-weight VMEM; matters once
    hidden_dim is scaled up on v7x's 64 MiB VMEM).
    """
    index_map = lambda i: (0,) * a.ndim
    try:
        return pl.BlockSpec(a.shape, index_map, pipeline_mode=pl.Buffered(1))
    except (AttributeError, TypeError):   # older jax without pipeline_mode
        return pl.BlockSpec(a.shape, index_map)


def _pick_batch_tile(B, cap):
    """Largest batch tile (multiple of 8, <= cap) giving an even grid >= 2.

    An even grid length lets the "parallel" batch axis shard evenly across the
    two TensorCores on v7x; a single huge tile amortizes per-step overhead.
    """
    if B <= 8:
        return _round_up(B, 8)
    nb = max(2, pl.cdiv(B, cap))
    if nb % 2:
        nb += 1
    return _round_up(pl.cdiv(B, nb), 8)


def discriminator_kernel(x_ref, w1_ref, b1_ref, w2_ref, b2_ref, w3_ref, b3_ref,
                         o_ref):
    """One batch tile of the whole MLP; weights are VMEM-resident bf16."""
    x = x_ref[...]
    if x.dtype != jnp.bfloat16:          # caller may already pass bf16 x
        x = x.astype(jnp.bfloat16)

    # Layer 1: Linear + LeakyReLU(0.2). bf16 MXU inputs, f32 accumulation.
    h = jnp.dot(x, w1_ref[...], preferred_element_type=jnp.float32) + b1_ref[...]
    h = _leaky_relu(h)

    # Layer 2: Linear + LeakyReLU(0.2).
    h = jnp.dot(h.astype(jnp.bfloat16), w2_ref[...],
                preferred_element_type=jnp.float32) + b2_ref[...]
    h = _leaky_relu(h)

    # Layer 3: Linear + exact Sigmoid (matches the reference bit-for-bit apart
    # from accumulation order).
    z = jnp.dot(h.astype(jnp.bfloat16), w3_ref[...],
                preferred_element_type=jnp.float32) + b3_ref[...]
    s = 1.0 / (1.0 + jnp.exp(-z))

    # Store only the real (unpadded) output columns. NOTE: when B % tb != 0
    # the garbage rows of the last x block flow through exp() and may be
    # inf/NaN — harmless, the out-of-bounds rows are never stored to HBM.
    o_ref[...] = s[:, :o_ref.shape[1]].astype(o_ref.dtype)


@functools.partial(jax.jit, static_argnames=("output_dim", "batch_tile"))
def discriminator_forward(x, params, output_dim=1, batch_tile=1024):
    """x: (B, input_dim) f32 or bf16. params: dict from init_params (bf16 W)."""
    w1, b1, w2, b2, w3, b3 = (params["w1"], params["b1"], params["w2"],
                              params["b2"], params["w3"], params["b3"])
    B, in_dim = x.shape
    assert w1.shape[0] == in_dim, (w1.shape, in_dim)

    tb = _pick_batch_tile(B, batch_tile)
    nb = pl.cdiv(B, tb)

    # Explicit VMEM budget: double-buffered x/out blocks + resident weights
    # (single buffer) + f32 hidden activations, with headroom. Keeps large
    # batch tiles viable above the 16/32 MiB scoped-VMEM defaults while
    # staying under v7x's 64 MiB physical VMEM.
    hid_p = w2.shape[0]
    wbytes = sum(a.size * a.dtype.itemsize for a in (w1, b1, w2, b2, w3, b3))
    block_bytes = (2 * tb * in_dim * x.dtype.itemsize      # x (double-buffered)
                   + 2 * tb * output_dim * 4               # out (double-buffered)
                   + 2 * tb * hid_p * 4                    # live f32 activations
                   + wbytes)                               # resident weights
    vmem_limit = min(int(block_bytes * 1.25) + (2 << 20), 64 << 20)

    out = pl.pallas_call(
        discriminator_kernel,
        out_shape=jax.ShapeDtypeStruct((B, output_dim), jnp.float32),
        grid=(nb,),
        in_specs=[
            pl.BlockSpec((tb, in_dim), lambda i: (i, 0)),   # x: tiled over batch
            _resident_spec(w1), _resident_spec(b1),
            _resident_spec(w2), _resident_spec(b2),
            _resident_spec(w3), _resident_spec(b3),
        ],
        out_specs=pl.BlockSpec((tb, output_dim), lambda i: (i, 0)),
        compiler_params=pltpu.CompilerParams(
            dimension_semantics=("parallel",),    # megacore sharding on v7x
            vmem_limit_bytes=vmem_limit),
    )(x, w1, b1, w2, b2, w3, b3)
    return out


def init_params(key, input_dim, hidden_dim, output_dim):
    """nn.Linear-style init: U(-1/sqrt(fan_in), +1/sqrt(fan_in)) for W and b.

    Weights stored (in, out) as bfloat16 with zero padding of hidden/output
    dims to lane multiples of 128; biases kept float32. Zero padding keeps the
    math identical to the unpadded PyTorch module.
    """
    hid_p = _round_up(hidden_dim, 128)   # 240 -> 256 (fills the 256-wide MXU)
    out_p = _round_up(output_dim, 128)

    def linear(key, fan_in, fan_out, in_rows, out_cols):
        kw, kb = jax.random.split(key)
        bound = 1.0 / jnp.sqrt(jnp.float32(fan_in))
        w = jax.random.uniform(kw, (fan_in, fan_out), jnp.float32, -bound, bound)
        b = jax.random.uniform(kb, (1, fan_out), jnp.float32, -bound, bound)
        w = jnp.pad(w, ((0, in_rows - fan_in), (0, out_cols - fan_out)))
        b = jnp.pad(b, ((0, 0), (0, out_cols - fan_out)))
        return w.astype(jnp.bfloat16), b   # bf16 weights, f32 biases

    k1, k2, k3 = jax.random.split(key, 3)
    w1, b1 = linear(k1, input_dim, hidden_dim, input_dim, hid_p)  # x unpadded
    w2, b2 = linear(k2, hidden_dim, hidden_dim, hid_p, hid_p)
    w3, b3 = linear(k3, hidden_dim, output_dim, hid_p, out_p)
    return {"w1": w1, "b1": b1, "w2": w2, "b2": b2, "w3": w3, "b3": b3}


def reference_forward(x, params, input_dim, hidden_dim, output_dim):
    """Pure-JAX reference with the SAME mixed precision as the kernel:
    bf16 matmul inputs, f32 accumulation, exact sigmoid."""
    w1 = params["w1"][:input_dim, :hidden_dim]
    b1 = params["b1"][:, :hidden_dim]
    w2 = params["w2"][:hidden_dim, :hidden_dim]
    b2 = params["b2"][:, :hidden_dim]
    w3 = params["w3"][:hidden_dim, :output_dim]
    b3 = params["b3"][:, :output_dim]

    dot = lambda a, w: jnp.dot(a.astype(jnp.bfloat16), w,
                               preferred_element_type=jnp.float32)
    h = _leaky_relu(dot(x, w1) + b1)
    h = _leaky_relu(dot(h, w2) + b2)
    z = dot(h, w3) + b3
    return 1.0 / (1.0 + jnp.exp(-z))


if __name__ == "__main__":
    # Small shapes consistent with the module's forward (x: (batch, input_dim)).
    batch, input_dim, hidden_dim, output_dim = 8, 64, 32, 1

    key = jax.random.PRNGKey(0)
    k_params, k_x = jax.random.split(key)
    params = init_params(k_params, input_dim, hidden_dim, output_dim)
    x = jax.random.normal(k_x, (batch, input_dim), jnp.float32)

    out = discriminator_forward(x, params, output_dim=output_dim)
    out = jax.block_until_ready(out)

    ref = reference_forward(x, params, input_dim, hidden_dim, output_dim)
    assert out.shape == (batch, output_dim), out.shape
    err = float(jnp.max(jnp.abs(out - ref)))
    assert err < 1e-3, f"max abs err {err}"

    print("KERNEL_OK")
</pallas_src>

<mosaic_0001>
module attributes {stable_mosaic.version = 11 : i64} {
  func.func @discriminator_kernel(%arg0: i32, %arg1: memref<8x64xf32, #tpu.memory_space<vmem>>, %arg2: memref<64x128xbf16, #tpu.memory_space<vmem>>, %arg3: memref<1x128xf32, #tpu.memory_space<vmem>>, %arg4: memref<128x128xbf16, #tpu.memory_space<vmem>>, %arg5: memref<1x128xf32, #tpu.memory_space<vmem>>, %arg6: memref<128x128xbf16, #tpu.memory_space<vmem>>, %arg7: memref<1x128xf32, #tpu.memory_space<vmem>>, %arg8: memref<8x1xf32, #tpu.memory_space<vmem>>) attributes {dimension_semantics = [#tpu.dimension_semantics<parallel>], iteration_bounds = array<i64: 1>, scalar_prefetch = 0 : i64, scratch_operands = 0 : i64, tpu.core_type = #tpu.core_type<tc>, window_params = [{transform_indices = @transform_0, window_bounds = array<i64: 8, 64>}, {pipeline_mode = #tpu.pipeline_mode<synchronous>, transform_indices = @transform_1, window_bounds = array<i64: 64, 128>}, {pipeline_mode = #tpu.pipeline_mode<synchronous>, transform_indices = @transform_2, window_bounds = array<i64: 1, 128>}, {pipeline_mode = #tpu.pipeline_mode<synchronous>, transform_indices = @transform_3, window_bounds = array<i64: 128, 128>}, {pipeline_mode = #tpu.pipeline_mode<synchronous>, transform_indices = @transform_4, window_bounds = array<i64: 1, 128>}, {pipeline_mode = #tpu.pipeline_mode<synchronous>, transform_indices = @transform_5, window_bounds = array<i64: 128, 128>}, {pipeline_mode = #tpu.pipeline_mode<synchronous>, transform_indices = @transform_6, window_bounds = array<i64: 1, 128>}, {transform_indices = @transform_7, window_bounds = array<i64: 8, 1>}]} {
    %c0 = arith.constant 0 : index
    %c0_0 = arith.constant 0 : index
    %0 = vector.load %arg1[%c0, %c0_0] : memref<8x64xf32, #tpu.memory_space<vmem>>, vector<8x64xf32>
    %1 = arith.truncf %0 : vector<8x64xf32> to vector<8x64xbf16>
    %c0_1 = arith.constant 0 : index
    %c0_2 = arith.constant 0 : index
    %2 = vector.load %arg2[%c0_1, %c0_2] : memref<64x128xbf16, #tpu.memory_space<vmem>>, vector<64x128xbf16>
    %cst = arith.constant dense<0.000000e+00> : vector<8x128xf32>
    %3 = tpu.matmul %1, %2, %cst {dimension_numbers = #tpu.dot_dimension_numbers<[1], [0], [0], [1], [0, 0, 1, 1], [], []>} : vector<8x64xbf16>, vector<64x128xbf16>, vector<8x128xf32> -> vector<8x128xf32>
    %c0_3 = arith.constant 0 : index
    %c0_4 = arith.constant 0 : index
    %4 = vector.load %arg3[%c0_3, %c0_4] : memref<1x128xf32, #tpu.memory_space<vmem>>, vector<1x128xf32>
    %5 = vector.broadcast %4 : vector<1x128xf32> to vector<8x128xf32>
    %6 = arith.addf %3, %5 : vector<8x128xf32>
    %cst_5 = arith.constant 0.000000e+00 : f32
    %7 = vector.broadcast %cst_5 : f32 to vector<8x128xf32>
    %8 = arith.cmpf ogt, %6, %7 : vector<8x128xf32>
    %cst_6 = arith.constant 2.000000e-01 : f32
    %9 = vector.broadcast %cst_6 : f32 to vector<8x128xf32>
    %10 = arith.mulf %9, %6 : vector<8x128xf32>
    %11 = arith.select %8, %6, %10 : vector<8x128xi1>, vector<8x128xf32>
    %12 = arith.truncf %11 : vector<8x128xf32> to vector<8x128xbf16>
    %c0_7 = arith.constant 0 : index
    %c0_8 = arith.constant 0 : index
    %13 = vector.load %arg4[%c0_7, %c0_8] : memref<128x128xbf16, #tpu.memory_space<vmem>>, vector<128x128xbf16>
    %cst_9 = arith.constant dense<0.000000e+00> : vector<8x128xf32>
    %14 = tpu.matmul %12, %13, %cst_9 {dimension_numbers = #tpu.dot_dimension_numbers<[1], [0], [0], [1], [0, 0, 1, 1], [], []>} : vector<8x128xbf16>, vector<128x128xbf16>, vector<8x128xf32> -> vector<8x128xf32>
    %c0_10 = arith.constant 0 : index
    %c0_11 = arith.constant 0 : index
    %15 = vector.load %arg5[%c0_10, %c0_11] : memref<1x128xf32, #tpu.memory_space<vmem>>, vector<1x128xf32>
    %16 = vector.broadcast %15 : vector<1x128xf32> to vector<8x128xf32>
    %17 = arith.addf %14, %16 : vector<8x128xf32>
    %cst_12 = arith.constant 0.000000e+00 : f32
    %18 = vector.broadcast %cst_12 : f32 to vector<8x128xf32>
    %19 = arith.cmpf ogt, %17, %18 : vector<8x128xf32>
    %cst_13 = arith.constant 2.000000e-01 : f32
    %20 = vector.broadcast %cst_13 : f32 to vector<8x128xf32>
    %21 = arith.mulf %20, %17 : vector<8x128xf32>
    %22 = arith.select %19, %17, %21 : vector<8x128xi1>, vector<8x128xf32>
    %23 = arith.truncf %22 : vector<8x128xf32> to vector<8x128xbf16>
    %c0_14 = arith.constant 0 : index
    %c0_15 = arith.constant 0 : index
    %24 = vector.load %arg6[%c0_14, %c0_15] : memref<128x128xbf16, #tpu.memory_space<vmem>>, vector<128x128xbf16>
    %cst_16 = arith.constant dense<0.000000e+00> : vector<8x128xf32>
    %25 = tpu.matmul %23, %24, %cst_16 {dimension_numbers = #tpu.dot_dimension_numbers<[1], [0], [0], [1], [0, 0, 1, 1], [], []>} : vector<8x128xbf16>, vector<128x128xbf16>, vector<8x128xf32> -> vector<8x128xf32>
    %c0_17 = arith.constant 0 : index
    %c0_18 = arith.constant 0 : index
    %26 = vector.load %arg7[%c0_17, %c0_18] : memref<1x128xf32, #tpu.memory_space<vmem>>, vector<1x128xf32>
    %27 = vector.broadcast %26 : vector<1x128xf32> to vector<8x128xf32>
    %28 = arith.addf %25, %27 : vector<8x128xf32>
    %cst_19 = arith.constant 0.000000e+00 : f32
    %29 = vector.broadcast %cst_19 : f32 to vector<8x128xf32>
    %30 = arith.subf %29, %28 : vector<8x128xf32>
    %31 = math.exp %30 : vector<8x128xf32>
    %cst_20 = arith.constant 1.000000e+00 : f32
    %32 = vector.broadcast %cst_20 : f32 to vector<8x128xf32>
    %33 = arith.addf %32, %31 : vector<8x128xf32>
    %cst_21 = arith.constant 1.000000e+00 : f32
    %34 = vector.broadcast %cst_21 : f32 to vector<8x128xf32>
    %35 = arith.divf %34, %33 : vector<8x128xf32>
    %36 = vector.extract_strided_slice %35 {offsets = [0, 0], sizes = [8, 1], strides = [1, 1]} : vector<8x128xf32> to vector<8x1xf32>
    %c0_22 = arith.constant 0 : index
    %c0_23 = arith.constant 0 : index
    %37 = vector.load %arg8[%c0_22, %c0_23] : memref<8x1xf32, #tpu.memory_space<vmem>>, vector<8x1xf32>
    tpu.vector_store %arg8[%c0_22, %c0_23], %36 {strides = array<i32>} : memref<8x1xf32, #tpu.memory_space<vmem>>, vector<8x1xf32>,
    return
  }
  func.func @transform_0(%arg0: i32) -> (i32, i32) {
    %c0_i32 = arith.constant 0 : i32
    %c0_i32_0 = arith.constant 0 : i32
    return %arg0, %c0_i32 : i32, i32
  }
  func.func @transform_1(%arg0: i32) -> (i32, i32) {
    %c0_i32 = arith.constant 0 : i32
    %c0_i32_0 = arith.constant 0 : i32
    %c0_i32_1 = arith.constant 0 : i32
    return %c0_i32, %c0_i32_0 : i32, i32
  }
  func.func @transform_2(%arg0: i32) -> (i32, i32) {
    %c0_i32 = arith.constant 0 : i32
    %c0_i32_0 = arith.constant 0 : i32
    %c0_i32_1 = arith.constant 0 : i32
    return %c0_i32, %c0_i32_0 : i32, i32
  }
  func.func @transform_3(%arg0: i32) -> (i32, i32) {
    %c0_i32 = arith.constant 0 : i32
    %c0_i32_0 = arith.constant 0 : i32
    %c0_i32_1 = arith.constant 0 : i32
    return %c0_i32, %c0_i32_0 : i32, i32
  }
  func.func @transform_4(%arg0: i32) -> (i32, i32) {
    %c0_i32 = arith.constant 0 : i32
    %c0_i32_0 = arith.constant 0 : i32
    %c0_i32_1 = arith.constant 0 : i32
    return %c0_i32, %c0_i32_0 : i32, i32
  }
  func.func @transform_5(%arg0: i32) -> (i32, i32) {
    %c0_i32 = arith.constant 0 : i32
    %c0_i32_0 = arith.constant 0 : i32
    %c0_i32_1 = arith.constant 0 : i32
    return %c0_i32, %c0_i32_0 : i32, i32
  }
  func.func @transform_6(%arg0: i32) -> (i32, i32) {
    %c0_i32 = arith.constant 0 : i32
    %c0_i32_0 = arith.constant 0 : i32
    %c0_i32_1 = arith.constant 0 : i32
    return %c0_i32, %c0_i32_0 : i32, i32
  }
  func.func @transform_7(%arg0: i32) -> (i32, i32) {
    %c0_i32 = arith.constant 0 : i32
    %c0_i32_0 = arith.constant 0 : i32
    return %arg0, %c0_i32 : i32, i32
  }
}

</mosaic_0001>

<bundles_post_ra>
// kernel: discriminator_forward.1
= control target key start
LH: loop header
LB: loop body
LE: loop exit
PB: predicated region body
PF: predicated region fallthrough
CT: control target
= control target key end

     0   :  { %12 = vsyncpa [#allocation3], 0  ;;  %s778_s0 = inlined_call_operand.hbm [shape: f32[8,64], index: 0, kind: input, shape index: {}]   ;;  %s779_s1 = inlined_call_operand.hbm [shape: bf16[64,128], index: 1, kind: input, shape index: {}]   ;;  %s780_s2 = inlined_call_operand.vmem [shape: f32[1,128], index: 2, kind: input, shape index: {}]   ;;  %s781_s3 = inlined_call_operand.hbm [shape: bf16[128,128], index: 3, kind: input, shape index: {}]   ;;  %s782_s4 = inlined_call_operand.vmem [shape: f32[1,128], index: 4, kind: input, shape index: {}]   ;;  %s783_s5 = inlined_call_operand.hbm [shape: bf16[128,128], index: 5, kind: input, shape index: {}]   ;;  %s784_s6 = inlined_call_operand.vmem [shape: f32[1,128], index: 6, kind: input, shape index: {}]   ;;  %s785_s7 = inlined_call_operand.vmem [shape: f32[8,1], index: 7, kind: output, shape index: {}]  }
   0x1   :  { %13 = vsyncpa [#allocation5], 0 }
   0x2   :  { %14 = vsyncpa [#allocation8], 0  ;;  %s635_s24 = smov [#allocation4]   ;;  %s541_s28 = scalar_lea.hbm %s779_s1, 512 }
   0x3   :  { %s30_s25 = sshll.u32 %s635_s24, 4  ;;  %p542_p0 = scmp.ne.s32.totalorder %s779_s1, %s541_s28  ;;  %s31_s25 = int_to_ptr.vmem [resolvable:$true] %s30_s25 }
   0x4   :  { %p545_p1 = scmp.lt.u32.totalorder %s541_s28, %s779_s1 }
   0x6   :  { %p547_p2 = pnand %p545_p1, %p542_p0 }
   0x8   :  { %550 = shalt.err (!%p547_p2)
}
   0x9   :  { %s551_s10 = scalar_lea.vmem %s31_s25, 512  ;;  %p556_p4 = scmp.lt.s32.totalorder %s31_s25, %s31_s25 }
   0xa   :  { %p552_p3 = scmp.ne.s32.totalorder %s31_s25, %s551_s10  ;;  %p557_p5 = scmp.lt.s32.totalorder %s551_s10, %s551_s10 }
   0xc   :  { %p558_p6 = por %p557_p5, %p556_p4 }
   0xe   :  { %p559_p7 = pnand %p558_p6, %p552_p3 }
  0x10   :  { %562 = shalt.err (!%p559_p7)
}
  0x11   :  { %s636_s11 = smov 64   ;;  %s637_s12 = smov 4  }
  0x12   :  { %36 = dma.hbm_to_vmem [thread:$0]  %s779_s1, 512, %s31_s25, [#allocation5], %s636_s11, %s636_s11, %s637_s12  }
  0x13   :  { %s638_s15 = smov [#allocation2]   ;;  %s639_s17 = smov [#allocation6]  }
  0x14   :  { %s21_s16 = sshll.u32 %s638_s15, 4  ;;  %s44_s18 = sshll.u32 %s639_s17, 4  ;;  %s22_s16 = int_to_ptr.vmem [resolvable:$true] %s21_s16  ;;  %s45_s18 = int_to_ptr.vmem [resolvable:$true] %s44_s18 }
  0x15   :  { %s563_s21 = scalar_lea.hbm %s778_s0, 128 }
  0x16   :  { %p564_p8 = scmp.ne.s32.totalorder %s778_s0, %s563_s21  ;;  %p567_p9 = scmp.lt.u32.totalorder %s563_s21, %s778_s0 }
  0x18   :  { %p569_p10 = pnand %p567_p9, %p564_p8 }
  0x1a   :  { %572 = shalt.err (!%p569_p10)
}
  0x1b   :  { %s573_s1 = scalar_lea.vmem %s22_s16, 128  ;;  %p578_p12 = scmp.lt.s32.totalorder %s22_s16, %s22_s16 }
  0x1c   :  { %p574_p11 = scmp.ne.s32.totalorder %s22_s16, %s573_s1  ;;  %p579_p13 = scmp.lt.s32.totalorder %s573_s1, %s573_s1 }
  0x1e   :  { %p580_p0 = por %p579_p13, %p578_p12 }
  0x20   :  { %p581_p1 = pnand %p580_p0, %p574_p11 }
  0x22   :  { %584 = shalt.err (!%p581_p1)
}
  0x23   :  { %24 = dma.hbm_to_vmem [thread:$0]  %s778_s0, 128, %s22_s16, [#allocation3]  }
  0x24   :  { %s585_s30 = scalar_lea.hbm %s781_s3, 1024 }
  0x25   :  { %p586_p2 = scmp.ne.s32.totalorder %s781_s3, %s585_s30  ;;  %p589_p3 = scmp.lt.u32.totalorder %s585_s30, %s781_s3 }
  0x27   :  { %p591_p4 = pnand %p589_p3, %p586_p2 }
  0x29   :  { %594 = shalt.err (!%p591_p4)
}
  0x2a   :  { %s595_s14 = scalar_lea.vmem %s45_s18, 1024  ;;  %p600_p6 = scmp.lt.s32.totalorder %s45_s18, %s45_s18 }
  0x2b   :  { %p596_p5 = scmp.ne.s32.totalorder %s45_s18, %s595_s14  ;;  %p601_p7 = scmp.lt.s32.totalorder %s595_s14, %s595_s14 }
  0x2d   :  { %p602_p8 = por %p601_p7, %p600_p6 }
  0x2f   :  { %p603_p9 = pnand %p602_p8, %p596_p5 }
  0x31   :  { %606 = shalt.err (!%p603_p9)
}
  0x32   :  { %50 = dma.hbm_to_vmem [thread:$0]  %s781_s3, 1024, %s45_s18, [#allocation5], %s636_s11, %s636_s11, %s637_s12  }
  0x33   :  { %s640_s16 = smov [#allocation7]   ;;  %s607_s21 = scalar_lea.hbm %s783_s5, 1024 }
  0x34   :  { %s58_s17 = sshll.u32 %s640_s16, 4  ;;  %p608_p10 = scmp.ne.s32.totalorder %s783_s5, %s607_s21  ;;  %s59_s17 = int_to_ptr.vmem [resolvable:$true] %s58_s17 }
  0x35   :  { %p611_p11 = scmp.lt.u32.totalorder %s607_s21, %s783_s5 }
  0x37   :  { %p613_p12 = pnand %p611_p11, %p608_p10 }
  0x39   :  { %616 = shalt.err (!%p613_p12)
}
  0x3a   :  { %s617_s1 = scalar_lea.vmem %s59_s17, 1024  ;;  %p622_p0 = scmp.lt.s32.totalorder %s59_s17, %s59_s17 }
  0x3b   :  { %p618_p13 = scmp.ne.s32.totalorder %s59_s17, %s617_s1  ;;  %p623_p1 = scmp.lt.s32.totalorder %s617_s1, %s617_s1 }
  0x3d   :  { %p624_p2 = por %p623_p1, %p622_p0 }
  0x3f   :  { %p625_p3 = pnand %p624_p2, %p618_p13 }
  0x41   :  { %628 = shalt.err (!%p625_p3)
}
  0x42   :  { %64 = dma.hbm_to_vmem [thread:$0]  %s783_s5, 1024, %s59_s17, [#allocation8], %s636_s11, %s636_s11, %s637_s12  }
  0x43   :  { %629 = dma.done.wait [#allocation3], 128  }
  0x44   :  { %630 = vsyncadd [#allocation3], 4294967168 }
  0x45   :  { %631 = dma.done.wait [#allocation5], 1536  }
  0x46   :  { %632 = vsyncadd [#allocation5], 4294965760 }
  0x47   :  { %633 = dma.done.wait [#allocation8], 1024  }
  0x48   :  { %634 = vsyncadd [#allocation8], 4294966272  ;;  %v641_v0 = vmov 0.0   ;;  %vm642_vm0 = vmmov 0   ;;  %v517_v1 = vld [vmem:[#allocation4] sm:$0xff]   ;;  %v518_v2 = vld [vmem:[#allocation4 + $0x8] sm:$0xff]  }
  0x49   :  { %457 = vmatprep.subr.bf16.mxu0 %v641_v0  ;;  %465 = vmatprep.mubr.msk.bf16.mxu0 %vm642_vm0, %v641_v0  ;;  %v521_v3 = vld [vmem:[#allocation6] sm:$0xff]   ;;  %v519_v4 = vld [vmem:[#allocation4 + $0x10] sm:$0xff]   ;;  %v522_v5 = vld [vmem:[#allocation6 + $0x8] sm:$0xff]   ;;  %vm121_vm1 = vcmask 523264   ;;  %vm401_vm4 = vcmask 7168  }
  0x4a   :  { %469 = vmatprep.subr.bf16.mxu1 %v641_v0  ;;  %485 = vmatprep.mubr.msk.bf16.mxu1 %vm642_vm0, %v641_v0  ;;  %v520_v6 = vld [vmem:[#allocation4 + $0x18] sm:$0xff]   ;;  %v523_v8 = vld [vmem:[#allocation6 + $0x10] sm:$0xff]   ;;  %v525_v11 = vld [vmem:[#allocation6 + $0x20] sm:$0xff]  }
  0x4b   :  { %458 = vmatpush3.bf16.msra.mxu0 %v517_v1  ;;  %470 = vmatpush3.bf16.msra.mxu1 %v521_v3  ;;  %v80_v7 = vld [vmem:[#allocation2] sm:$0xff]  ;;  %v526_v12 = vld [vmem:[#allocation6 + $0x28] sm:$0xff]   ;;  %v527_v13 = vld [vmem:[#allocation6 + $0x30] sm:$0xff]  }
  0x4c   :  { %459 = vmatprep.subr.bf16.mxu0 %v641_v0  ;;  %471 = vmatprep.subr.bf16.mxu1 %v641_v0  ;;  %v81_v9 = vpack.c.bf16 %v80_v7, %v80_v7  ;;  %v524_v10 = vld [vmem:[#allocation6 + $0x18] sm:$0xff]   ;;  %v529_v15 = vld [vmem:[#allocation7] sm:$0xff]   ;;  %v530_v16 = vld [vmem:[#allocation7 + $0x8] sm:$0xff]  }
  0x4d   :  { %v528_v14 = vld [vmem:[#allocation6 + $0x38] sm:$0xff]   ;;  %v531_v17 = vld [vmem:[#allocation7 + $0x10] sm:$0xff]   ;;  %v533_v19 = vld [vmem:[#allocation7 + $0x20] sm:$0xff]  }
  0x4e   :  { %v532_v18 = vld [vmem:[#allocation7 + $0x18] sm:$0xff]   ;;  %v534_v20 = vld [vmem:[#allocation7 + $0x28] sm:$0xff]   ;;  %v535_v30 = vld [vmem:[#allocation7 + $0x30] sm:$0xff]  }
  0x4f   :  { %460 = vmatpush3.bf16.msra.mxu0 %v518_v2  ;;  %472 = vmatpush3.bf16.msra.mxu1 %v522_v5  ;;  %v410_v21 = vld [vmem:[%s780_s2] ss:$0 sm:$0xff] }
  0x50   :  { %461 = vmatprep.subr.bf16.mxu0 %v641_v0  ;;  %473 = vmatprep.subr.bf16.mxu1 %v641_v0  ;;  %v536_v31 = vld [vmem:[#allocation7 + $0x38] sm:$0xff]  }
  0x51   :  { %v416_v32 = vld [vmem:[%s782_s4] ss:$0 sm:$0xff] }
  0x52   :  { %v425_v41 = vld [vmem:[%s784_s6] ss:$0 sm:$0xff] }
  0x53   :  { %462 = vmatpush3.bf16.msra.mxu0 %v519_v4  ;;  %474 = vmatpush3.bf16.msra.mxu1 %v523_v8 }
  0x54   :  { %463 = vmatprep.subr.bf16.mxu0 %v641_v0  ;;  %475 = vmatprep.subr.bf16.mxu1 %v641_v0 }
  0x57   :  { %464 = vmatpush3.bf16.msra.mxu0 %v520_v6  ;;  %476 = vmatpush3.bf16.msra.mxu1 %v524_v10 }
  0x58   :  { %489 = vmatprep.subr.bf16.mxu0 %v641_v0  ;;  %477 = vmatprep.subr.bf16.mxu1 %v641_v0 }
  0x5a   :  { %466 = vmatmul.mubr.msk.bf16.vlgmr.msra.gmra.mrb[0].mxu0 %vm121_vm1, %v81_v9 }
  0x5b   :  { %505 = vmatprep.mubr.msk.bf16.mxu0 %vm642_vm0, %v641_v0  ;;  %478 = vmatpush3.bf16.msra.mxu1 %v525_v11 }
  0x5c   :  { %479 = vmatprep.subr.bf16.mxu1 %v641_v0  ;;  %490 = vmatpush3.bf16.msra.mxu0 %v529_v15 }
  0x5d   :  { %491 = vmatprep.subr.bf16.mxu0 %v641_v0 }
  0x5f   :  { %480 = vmatpush3.bf16.msra.mxu1 %v526_v12 }
  0x60   :  { %481 = vmatprep.subr.bf16.mxu1 %v641_v0  ;;  %492 = vmatpush3.bf16.msra.mxu0 %v530_v16 }
  0x61   :  { %493 = vmatprep.subr.bf16.mxu0 %v641_v0 }
  0x63   :  { %482 = vmatpush3.bf16.msra.mxu1 %v527_v13 }
  0x64   :  { %483 = vmatprep.subr.bf16.mxu1 %v641_v0  ;;  %494 = vmatpush3.bf16.msra.mxu0 %v531_v17 }
  0x65   :  { %495 = vmatprep.subr.bf16.mxu0 %v641_v0 }
  0x67   :  { %484 = vmatpush3.bf16.msra.mxu1 %v528_v14 }
  0x68   :  { %496 = vmatpush3.bf16.msra.mxu0 %v532_v18 }
  0x69   :  { %497 = vmatprep.subr.bf16.mxu0 %v641_v0 }
  0x6c   :  { %498 = vmatpush3.bf16.msra.mxu0 %v533_v19 }
  0x6d   :  { %499 = vmatprep.subr.bf16.mxu0 %v641_v0 }
  0x70   :  { %500 = vmatpush3.bf16.msra.mxu0 %v534_v20 }
  0x71   :  { %501 = vmatprep.subr.bf16.mxu0 %v641_v0 }
  0x74   :  { %502 = vmatpush3.bf16.msra.mxu0 %v535_v30 }
  0x75   :  { %503 = vmatprep.subr.bf16.mxu0 %v641_v0 }
  0x78   :  { %504 = vmatpush3.bf16.msra.mxu0 %v536_v31 }
 0x12d   :  { %v159_v22 = vpop.f32.mrb[0].mxu0 }
 0x12e   :  { %v160_v23 = vadd.f32 %v410_v21, %v159_v22  ;;  %v467_v24 = vpop.f32.mrb[1].mxu0 }
 0x12f   :  { %v162_v25 = vpop.f32.mrb[2].mxu0 }
 0x130   :  { %vm165_vm2 = vcmp.gt.f32.partialorder %v160_v23, 0.0  ;;  %v166_v26 = vmul.f32 0.2, %v160_v23  ;;  %v468_v27 = vpop.f32.mrb[3].mxu0 }
 0x132   :  { %v167_v28 = vsel %vm165_vm2, %v160_v23, %v166_v26 }
 0x133   :  { %v168_v29 = vpack.c.bf16 %v167_v28, %v167_v28 }
 0x135   :  { %486 = vmatmul.mubr.bf16.vlgmr.msra.gmra.mrb[0].mxu1 %v168_v29 }
 0x208   :  { %v274_v33 = vpop.f32.mrb[0].mxu1 }
 0x209   :  { %v275_v34 = vadd.f32 %v416_v32, %v274_v33  ;;  %v487_v35 = vpop.f32.mrb[1].mxu1 }
 0x20a   :  { %v277_v36 = vpop.f32.mrb[2].mxu1 }
 0x20b   :  { %vm280_vm3 = vcmp.gt.f32.partialorder %v275_v34, 0.0  ;;  %v281_v37 = vmul.f32 0.2, %v275_v34  ;;  %v488_v38 = vpop.f32.mrb[3].mxu1 }
 0x20d   :  { %v282_v39 = vsel %vm280_vm3, %v275_v34, %v281_v37 }
 0x20e   :  { %v283_v40 = vpack.c.bf16 %v282_v39, %v282_v39 }
 0x210   :  { %506 = vmatmul.mubr.bf16.vlgmr.msra.gmra.mrb[4].mxu0 %v283_v40 }
 0x2e3   :  { %v389_v42 = vpop.f32.mrb[4].mxu0 }
 0x2e4   :  { %v390_v43 = vadd.f32 %v425_v41, %v389_v42  ;;  %v507_v44 = vpop.f32.mrb[5].mxu0 }
 0x2e5   :  { %v392_v45 = vpop.f32.mrb[6].mxu0 }
 0x2e6   :  { %v395_v46 = vsub.f32 0.0, %v390_v43  ;;  %v508_v47 = vpop.f32.mrb[7].mxu0 }
 0x2e8   :  { %v396_v48 = vmul.f32 1.442695, %v395_v46 }
 0x2ea   :  { %537 = vpow2.f32 %v396_v48 }
 0x2f4   :  { %v538_v49 = vpop.eup %537 }
 0x2f5   :  { %v398_v50 = vadd.f32 1.0, %v538_v49 }
 0x2f7   :  { %539 = vrcp.f32 %v398_v50 }
 0x301   :  { %v540_v51 = vpop.eup %539 }
 0x302   :  { %402 = vst.msk [vmem:[%s785_s7] sm:$0xff] %vm401_vm4, %v540_v51 }
 0x303   :  { %407 = vsyncpa [#allocation3], 1 }
 0x304   :  { %408 = vsyncpa [#allocation5], 1 }
 0x305   :  { %409 = vsyncpa [#allocation8], 1 }

</bundles_post_ra>
